<compile_context>
chip_gen: v5e
topology: v5e:2x2
jax: 0.10.0
libtpu: 0.0.40
codegen_flags: <defaults>
</compile_context>

<pallas_src>
import jax
import jax.numpy as jnp
from jax.experimental import pallas as pl
from jax.experimental.pallas import tpu as pltpu


# dim_x * dim_s threshold below which the contraction stays on the VPU.
_SMALL_CONTRACTION = 256
# Double-buffered working-set budget for the HW tile (conservative on v7x).
_VMEM_BUDGET_BYTES = 24 * 1024 * 1024


def decoder_kernel(xf_ref, ws_ref, bias_ref, o_ref):
    # xf_ref  : (B, dim_s, T)   channels on sublanes, pixels on lanes
    # ws_ref  : (dim_x, dim_s)  1x1-conv weight block acting on xf channels
    # bias_ref: (B, dim_x, 1)   per-batch fused bias (W_a @ xg + conv bias), f32
    # o_ref   : (B, dim_x, T)   lane-dense output
    B, dim_s, T = xf_ref.shape
    dim_x = ws_ref.shape[0]
    w = ws_ref[...].astype(jnp.float32)                      # (dim_x, dim_s)

    if dim_x * dim_s <= _SMALL_CONTRACTION:
        # Tiny contraction: a few broadcast multiply-adds on the VPU; the MXU
        # would be >97% padding and only adds result-FIFO latency here.
        for b in range(B):                                   # B static, unrolled
            xf_b = xf_ref[b].astype(jnp.float32)             # (dim_s, T)
            acc = jnp.zeros((dim_x, T), jnp.float32)
            for c in range(dim_s):                           # dim_s static, unrolled
                acc = acc + w[:, c:c + 1] * xf_b[c:c + 1, :]
            o_ref[b] = (acc + bias_ref[b]).astype(o_ref.dtype)
    else:
        # Larger channel dims: use the MXU.
        for b in range(B):
            y = jnp.dot(w, xf_ref[b].astype(jnp.float32),
                        preferred_element_type=jnp.float32) + bias_ref[b]
            o_ref[b] = y.astype(o_ref.dtype)


def _pick_hw_tile(hw, per_pixel_bytes, budget_bytes):
    """Largest lane tile (multiple of 128, dividing HW) whose double-buffered
    working set fits the budget; fall back to the full HW extent."""
    if hw * per_pixel_bytes <= budget_bytes or hw % 128 != 0:
        return hw
    max_pixels = max(128, (budget_bytes // per_pixel_bytes) // 128 * 128)
    t = min(hw, max_pixels)
    while t >= 128:
        if hw % t == 0:
            return t
        t -= 128
    return hw


@jax.jit
def decoder_forward(xf_nchw, xg_nc11, conv_w, conv_b):
    """xf_nchw: (B, dim_s, H, W); xg_nc11: (B, dim_a, 1, 1);
    conv_w: (dim_x, dim_s+dim_a, 1, 1); conv_b: (dim_x,). Returns (B, dim_x, H, W)."""
    B, dim_s, H, Wd = xf_nchw.shape
    dim_a = xg_nc11.shape[1]
    dim_x = conv_w.shape[0]
    HW = H * Wd

    # NCHW-native flatten (free reshape, no transpose / HBM round-trip)
    xf = xf_nchw.reshape(B, dim_s, HW)                          # (B, dim_s, HW)

    # split the 1x1-conv weight into the xf / xg channel blocks
    Wm = conv_w.reshape(dim_x, dim_s + dim_a)
    W_s = Wm[:, :dim_s]                                         # (dim_x, dim_s)
    W_a = Wm[:, dim_s:]                                         # (dim_x, dim_a)

    # fold the per-batch xg contribution + conv bias into one fused bias
    xg = xg_nc11.reshape(B, dim_a)                              # (B, dim_a)
    fused_bias = (xg @ W_a.T + conv_b[None, :]).astype(jnp.float32)
    fused_bias = fused_bias.reshape(B, dim_x, 1)                # (B, dim_x, 1)

    # HW (pixel) tiling: single step when everything fits VMEM, otherwise
    # 128-lane-multiple tiles sized against the double-buffered budget.
    itemsize = jnp.dtype(xf_nchw.dtype).itemsize
    per_pixel_bytes = 2 * B * (dim_s + dim_x) * itemsize        # 2 = double buffer
    tile_hw = _pick_hw_tile(HW, per_pixel_bytes, _VMEM_BUDGET_BYTES)
    num_tiles = HW // tile_hw

    # Single TC does the whole job when there's only one tile (grid=(1,) is a
    # trivial loop); only mark the pixel axis parallel when there is real
    # per-step work to shard across v7x's two TensorCores.
    semantics = ("parallel",) if num_tiles > 1 else ("arbitrary",)

    out = pl.pallas_call(
        decoder_kernel,
        out_shape=jax.ShapeDtypeStruct((B, dim_x, HW), xf_nchw.dtype),
        grid_spec=pltpu.PrefetchScalarGridSpec(
            num_scalar_prefetch=0,
            grid=(num_tiles,),
            in_specs=[
                pl.BlockSpec((B, dim_s, tile_hw), lambda t: (0, 0, t)),
                pl.BlockSpec((dim_x, dim_s), lambda t: (0, 0)),
                pl.BlockSpec((B, dim_x, 1), lambda t: (0, 0, 0)),
            ],
            out_specs=pl.BlockSpec((B, dim_x, tile_hw), lambda t: (0, 0, t)),
        ),
        compiler_params=pltpu.CompilerParams(
            dimension_semantics=semantics),
    )(xf, W_s, fused_bias)

    # free reshape back to NCHW
    return out.reshape(B, dim_x, H, Wd)


def decoder_reference(xf_nchw, xg_nc11, conv_w, conv_b):
    """Pure-JAX reference mirroring the PyTorch forward (repeat + cat + 1x1 conv)."""
    B, _, H, W = xf_nchw.shape
    xg2 = jnp.broadcast_to(xg_nc11, (B, xg_nc11.shape[1], H, W))
    x = jnp.concatenate([xf_nchw, xg2], axis=1)                     # (B, Cin, H, W)
    Wm = conv_w.reshape(conv_w.shape[0], conv_w.shape[1])           # (dim_x, Cin)
    y = jnp.einsum("bchw,oc->bohw", x, Wm) + conv_b[None, :, None, None]
    return y


if __name__ == "__main__":
    # args.dim_enc_s, args.dim_enc_a, args.dim_x
    dim_s, dim_a, dim_x = 4, 4, 8
    B, H, W = 2, 16, 16

    key = jax.random.PRNGKey(0)
    k1, k2, k3, k4 = jax.random.split(key, 4)

    xf = jax.random.normal(k1, (B, dim_s, H, W), dtype=jnp.float32)
    xg = jax.random.normal(k2, (B, dim_a, 1, 1), dtype=jnp.float32)

    # deterministic parameter init for nn.Conv2d(dim_s+dim_a, dim_x, 1)
    conv_w = 0.1 * jax.random.normal(k3, (dim_x, dim_s + dim_a, 1, 1), dtype=jnp.float32)
    conv_b = 0.1 * jax.random.normal(k4, (dim_x,), dtype=jnp.float32)

    y = decoder_forward(xf, xg, conv_w, conv_b)
    y = jax.block_until_ready(y)

    y_ref = decoder_reference(xf, xg, conv_w, conv_b)
    assert y.shape == (B, dim_x, H, W)
    assert jnp.allclose(y, y_ref, atol=1e-5, rtol=1e-5)

    print("KERNEL_OK")
</pallas_src>

<mosaic_0001>
module attributes {stable_mosaic.version = 11 : i64} {
  func.func @decoder_kernel(%arg0: i32, %arg1: memref<2x4x256xf32, #tpu.memory_space<vmem>>, %arg2: memref<8x4xf32, #tpu.memory_space<vmem>>, %arg3: memref<2x8x1xf32, #tpu.memory_space<vmem>>, %arg4: memref<2x8x256xf32, #tpu.memory_space<vmem>>) attributes {dimension_semantics = [#tpu.dimension_semantics<arbitrary>], iteration_bounds = array<i64: 1>, scalar_prefetch = 0 : i64, scratch_operands = 0 : i64, tpu.core_type = #tpu.core_type<tc>, window_params = [{transform_indices = @transform_0, window_bounds = array<i64: 2, 4, 256>}, {pipeline_mode = #tpu.pipeline_mode<synchronous>, transform_indices = @transform_1, window_bounds = array<i64: 8, 4>}, {pipeline_mode = #tpu.pipeline_mode<synchronous>, transform_indices = @transform_2, window_bounds = array<i64: 2, 8, 1>}, {transform_indices = @transform_3, window_bounds = array<i64: 2, 8, 256>}]} {
    %c0 = arith.constant 0 : index
    %c0_0 = arith.constant 0 : index
    %0 = vector.load %arg2[%c0, %c0_0] : memref<8x4xf32, #tpu.memory_space<vmem>>, vector<8x4xf32>
    %c0_1 = arith.constant 0 : index
    %c0_2 = arith.constant 0 : index
    %c0_3 = arith.constant 0 : index
    %1 = vector.load %arg1[%c0_1, %c0_2, %c0_3] : memref<2x4x256xf32, #tpu.memory_space<vmem>>, vector<1x4x256xf32>
    %2 = vector.shape_cast %1 : vector<1x4x256xf32> to vector<4x256xf32>
    %cst = arith.constant 0.000000e+00 : f32
    %3 = vector.broadcast %cst : f32 to vector<8x256xf32>
    %4 = vector.extract_strided_slice %0 {offsets = [0, 0], sizes = [8, 1], strides = [1, 1]} : vector<8x4xf32> to vector<8x1xf32>
    %5 = vector.extract_strided_slice %2 {offsets = [0, 0], sizes = [1, 256], strides = [1, 1]} : vector<4x256xf32> to vector<1x256xf32>
    %6 = vector.broadcast %4 : vector<8x1xf32> to vector<8x256xf32>
    %7 = vector.broadcast %5 : vector<1x256xf32> to vector<8x256xf32>
    %8 = arith.mulf %6, %7 : vector<8x256xf32>
    %9 = arith.addf %3, %8 : vector<8x256xf32>
    %10 = vector.extract_strided_slice %0 {offsets = [0, 1], sizes = [8, 1], strides = [1, 1]} : vector<8x4xf32> to vector<8x1xf32>
    %11 = vector.extract_strided_slice %2 {offsets = [1, 0], sizes = [1, 256], strides = [1, 1]} : vector<4x256xf32> to vector<1x256xf32>
    %12 = vector.broadcast %10 : vector<8x1xf32> to vector<8x256xf32>
    %13 = vector.broadcast %11 : vector<1x256xf32> to vector<8x256xf32>
    %14 = arith.mulf %12, %13 : vector<8x256xf32>
    %15 = arith.addf %9, %14 : vector<8x256xf32>
    %16 = vector.extract_strided_slice %0 {offsets = [0, 2], sizes = [8, 1], strides = [1, 1]} : vector<8x4xf32> to vector<8x1xf32>
    %17 = vector.extract_strided_slice %2 {offsets = [2, 0], sizes = [1, 256], strides = [1, 1]} : vector<4x256xf32> to vector<1x256xf32>
    %18 = vector.broadcast %16 : vector<8x1xf32> to vector<8x256xf32>
    %19 = vector.broadcast %17 : vector<1x256xf32> to vector<8x256xf32>
    %20 = arith.mulf %18, %19 : vector<8x256xf32>
    %21 = arith.addf %15, %20 : vector<8x256xf32>
    %22 = vector.extract_strided_slice %0 {offsets = [0, 3], sizes = [8, 1], strides = [1, 1]} : vector<8x4xf32> to vector<8x1xf32>
    %23 = vector.extract_strided_slice %2 {offsets = [3, 0], sizes = [1, 256], strides = [1, 1]} : vector<4x256xf32> to vector<1x256xf32>
    %24 = vector.broadcast %22 : vector<8x1xf32> to vector<8x256xf32>
    %25 = vector.broadcast %23 : vector<1x256xf32> to vector<8x256xf32>
    %26 = arith.mulf %24, %25 : vector<8x256xf32>
    %27 = arith.addf %21, %26 : vector<8x256xf32>
    %c0_4 = arith.constant 0 : index
    %c0_5 = arith.constant 0 : index
    %c0_6 = arith.constant 0 : index
    %28 = vector.load %arg3[%c0_4, %c0_5, %c0_6] : memref<2x8x1xf32, #tpu.memory_space<vmem>>, vector<1x8x1xf32>
    %29 = vector.shape_cast %28 : vector<1x8x1xf32> to vector<8x1xf32>
    %30 = vector.broadcast %29 : vector<8x1xf32> to vector<8x256xf32>
    %31 = arith.addf %27, %30 : vector<8x256xf32>
    %c0_7 = arith.constant 0 : index
    %c0_8 = arith.constant 0 : index
    %c0_9 = arith.constant 0 : index
    %32 = vector.load %arg4[%c0_7, %c0_8, %c0_9] : memref<2x8x256xf32, #tpu.memory_space<vmem>>, vector<1x8x256xf32>
    %33 = vector.shape_cast %32 : vector<1x8x256xf32> to vector<8x256xf32>
    %34 = vector.shape_cast %31 : vector<8x256xf32> to vector<1x8x256xf32>
    tpu.vector_store %arg4[%c0_7, %c0_8, %c0_9], %34 {strides = array<i32>} : memref<2x8x256xf32, #tpu.memory_space<vmem>>, vector<1x8x256xf32>,
    %c1 = arith.constant 1 : index
    %c0_10 = arith.constant 0 : index
    %c0_11 = arith.constant 0 : index
    %35 = vector.load %arg1[%c1, %c0_10, %c0_11] : memref<2x4x256xf32, #tpu.memory_space<vmem>>, vector<1x4x256xf32>
    %36 = vector.shape_cast %35 : vector<1x4x256xf32> to vector<4x256xf32>
    %cst_12 = arith.constant 0.000000e+00 : f32
    %37 = vector.broadcast %cst_12 : f32 to vector<8x256xf32>
    %38 = vector.extract_strided_slice %0 {offsets = [0, 0], sizes = [8, 1], strides = [1, 1]} : vector<8x4xf32> to vector<8x1xf32>
    %39 = vector.extract_strided_slice %36 {offsets = [0, 0], sizes = [1, 256], strides = [1, 1]} : vector<4x256xf32> to vector<1x256xf32>
    %40 = vector.broadcast %38 : vector<8x1xf32> to vector<8x256xf32>
    %41 = vector.broadcast %39 : vector<1x256xf32> to vector<8x256xf32>
    %42 = arith.mulf %40, %41 : vector<8x256xf32>
    %43 = arith.addf %37, %42 : vector<8x256xf32>
    %44 = vector.extract_strided_slice %0 {offsets = [0, 1], sizes = [8, 1], strides = [1, 1]} : vector<8x4xf32> to vector<8x1xf32>
    %45 = vector.extract_strided_slice %36 {offsets = [1, 0], sizes = [1, 256], strides = [1, 1]} : vector<4x256xf32> to vector<1x256xf32>
    %46 = vector.broadcast %44 : vector<8x1xf32> to vector<8x256xf32>
    %47 = vector.broadcast %45 : vector<1x256xf32> to vector<8x256xf32>
    %48 = arith.mulf %46, %47 : vector<8x256xf32>
    %49 = arith.addf %43, %48 : vector<8x256xf32>
    %50 = vector.extract_strided_slice %0 {offsets = [0, 2], sizes = [8, 1], strides = [1, 1]} : vector<8x4xf32> to vector<8x1xf32>
    %51 = vector.extract_strided_slice %36 {offsets = [2, 0], sizes = [1, 256], strides = [1, 1]} : vector<4x256xf32> to vector<1x256xf32>
    %52 = vector.broadcast %50 : vector<8x1xf32> to vector<8x256xf32>
    %53 = vector.broadcast %51 : vector<1x256xf32> to vector<8x256xf32>
    %54 = arith.mulf %52, %53 : vector<8x256xf32>
    %55 = arith.addf %49, %54 : vector<8x256xf32>
    %56 = vector.extract_strided_slice %0 {offsets = [0, 3], sizes = [8, 1], strides = [1, 1]} : vector<8x4xf32> to vector<8x1xf32>
    %57 = vector.extract_strided_slice %36 {offsets = [3, 0], sizes = [1, 256], strides = [1, 1]} : vector<4x256xf32> to vector<1x256xf32>
    %58 = vector.broadcast %56 : vector<8x1xf32> to vector<8x256xf32>
    %59 = vector.broadcast %57 : vector<1x256xf32> to vector<8x256xf32>
    %60 = arith.mulf %58, %59 : vector<8x256xf32>
    %61 = arith.addf %55, %60 : vector<8x256xf32>
    %c1_13 = arith.constant 1 : index
    %c0_14 = arith.constant 0 : index
    %c0_15 = arith.constant 0 : index
    %62 = vector.load %arg3[%c1_13, %c0_14, %c0_15] : memref<2x8x1xf32, #tpu.memory_space<vmem>>, vector<1x8x1xf32>
    %63 = vector.shape_cast %62 : vector<1x8x1xf32> to vector<8x1xf32>
    %64 = vector.broadcast %63 : vector<8x1xf32> to vector<8x256xf32>
    %65 = arith.addf %61, %64 : vector<8x256xf32>
    %c1_16 = arith.constant 1 : index
    %c0_17 = arith.constant 0 : index
    %c0_18 = arith.constant 0 : index
    %66 = vector.load %arg4[%c1_16, %c0_17, %c0_18] : memref<2x8x256xf32, #tpu.memory_space<vmem>>, vector<1x8x256xf32>
    %67 = vector.shape_cast %66 : vector<1x8x256xf32> to vector<8x256xf32>
    %68 = vector.shape_cast %65 : vector<8x256xf32> to vector<1x8x256xf32>
    tpu.vector_store %arg4[%c1_16, %c0_17, %c0_18], %68 {strides = array<i32>} : memref<2x8x256xf32, #tpu.memory_space<vmem>>, vector<1x8x256xf32>,
    return
  }
  func.func @transform_0(%arg0: i32) -> (i32, i32, i32) {
    %c0_i32 = arith.constant 0 : i32
    %c0_i32_0 = arith.constant 0 : i32
    %c0_i32_1 = arith.constant 0 : i32
    return %c0_i32, %c0_i32_0, %arg0 : i32, i32, i32
  }
  func.func @transform_1(%arg0: i32) -> (i32, i32) {
    %c0_i32 = arith.constant 0 : i32
    %c0_i32_0 = arith.constant 0 : i32
    %c0_i32_1 = arith.constant 0 : i32
    return %c0_i32, %c0_i32_0 : i32, i32
  }
  func.func @transform_2(%arg0: i32) -> (i32, i32, i32) {
    %c0_i32 = arith.constant 0 : i32
    %c0_i32_0 = arith.constant 0 : i32
    %c0_i32_1 = arith.constant 0 : i32
    %c0_i32_2 = arith.constant 0 : i32
    return %c0_i32, %c0_i32_0, %c0_i32_1 : i32, i32, i32
  }
  func.func @transform_3(%arg0: i32) -> (i32, i32, i32) {
    %c0_i32 = arith.constant 0 : i32
    %c0_i32_0 = arith.constant 0 : i32
    %c0_i32_1 = arith.constant 0 : i32
    return %c0_i32, %c0_i32_0, %arg0 : i32, i32, i32
  }
}

</mosaic_0001>

<bundles_post_ra>
// kernel: decoder_forward.1
= control target key start
LH: loop header
LB: loop body
LE: loop exit
PB: predicated region body
PF: predicated region fallthrough
CT: control target
= control target key end

     0   :  { %v157_v0 = vmov 0   ;;  %v158_v2 = vmov 2   ;;  %v159_v5 = vmov 1   ;;  %v160_v6 = vmov 3   ;;  %s208_s1 = inlined_call_operand.vmem [shape: f32[8,4], index: 1, kind: input, shape index: {}]   ;;  %s209_s2 = inlined_call_operand.vmem [shape: f32[2,8,1], index: 2, kind: input, shape index: {}]   ;;  %s210_s0 = inlined_call_operand.vmem [shape: f32[2,4,256], index: 0, kind: input, shape index: {}]   ;;  %s211_s3 = inlined_call_operand.vmem [shape: f32[2,8,256], index: 3, kind: output, shape index: {}]  }
   0x1   :  { %151 = vset.pattern.permute.xlu0 %v157_v0  ;;  %v14_v1 = vld [vmem:[%s208_s1] sm:$0xff]  ;;  %153 = vset.pattern.permute.xlu1 %v158_v2  ;;  %v144_v4 = vld [vmem:[%s209_s2 + $0x8] sm:$0xff] }
   0x2   :  { %v74_v3 = vld [vmem:[%s209_s2] sm:$0xff]  ;;  %18 = vperm.xlu0 %151, %v14_v1   ;;  %47 = vperm.xlu1 %153, %v14_v1   ;;  %v143_v8 = vld [vmem:[%s210_s0 + $0x8] sm:$0xff] }
   0x3   :  { %155 = vset.pattern.permute.xlu2 %v157_v0  ;;  %v15_v7 = vld [vmem:[%s210_s0] sm:$0xff]  ;;  %v87_v12 = vperm.slane %v143_v8, 0  ;;  %v88_v13 = vperm.slane %v143_v8, 4  ;;  %v107_v17 = vperm.slane %v143_v8, 2  ;;  %v108_v18 = vperm.slane %v143_v8, 6 }
   0x4   :  { %77 = vperm.xlu2 %155, %v74_v3   ;;  %v22_v10 = vperm.slane %v15_v7, 0  ;;  %v23_v11 = vperm.slane %v15_v7, 4  ;;  %v50_v15 = vperm.slane %v15_v7, 2  ;;  %v51_v16 = vperm.slane %v15_v7, 6 }
   0x5   :  { %v36_v19 = vperm.slane %v15_v7, 1  ;;  %v37_v20 = vperm.slane %v15_v7, 5  ;;  %v97_v21 = vperm.slane %v143_v8, 1  ;;  %v98_v22 = vperm.slane %v143_v8, 5 }
   0x6   :  { %v64_v23 = vperm.slane %v15_v7, 3  ;;  %v65_v24 = vperm.slane %v15_v7, 7  ;;  %v117_v25 = vperm.slane %v143_v8, 3  ;;  %v118_v26 = vperm.slane %v143_v8, 7 }
   0x7   :  { %v26_v27 = vperm.slane %v22_v10, 0  ;;  %v27_v28 = vperm.slane %v23_v11, 0  ;;  %v91_v29 = vperm.slane %v87_v12, 0  ;;  %v92_v30 = vperm.slane %v88_v13, 0 }
   0x8   :  { %v54_v31 = vperm.slane %v50_v15, 2  ;;  %v55_v32 = vperm.slane %v51_v16, 2  ;;  %v111_v33 = vperm.slane %v107_v17, 2  ;;  %v112_v34 = vperm.slane %v108_v18, 2 }
   0x9   :  { %v40_v35 = vperm.slane %v36_v19, 1  ;;  %v41_v36 = vperm.slane %v37_v20, 1  ;;  %v101_v37 = vperm.slane %v97_v21, 1  ;;  %v102_v38 = vperm.slane %v98_v22, 1 }
   0xa   :  { %152 = vset.pattern.permute.xlu0 %v159_v5  ;;  %154 = vset.pattern.permute.xlu1 %v160_v6  ;;  %v68_v40 = vperm.slane %v64_v23, 3  ;;  %v69_v41 = vperm.slane %v65_v24, 3  ;;  %v121_v42 = vperm.slane %v117_v25, 3  ;;  %v122_v43 = vperm.slane %v118_v26, 3 }
   0xb   :  { %33 = vperm.xlu0 %152, %v14_v1   ;;  %61 = vperm.xlu1 %154, %v14_v1  }
   0xc   :  { %131 = vperm.xlu2 %155, %v144_v4  }
  0x13   :  { %156 = vset.pattern.permute.xlu0 %v157_v0 }
  0x5e   :  { %v78_v39 = vpop.permute.xlu2 %77 }
  0x66   :  { %v132_v10 = vpop.permute.xlu2 %131 }
  0x74   :  { %v19_v9 = vpop.permute.xlu0 %18  ;;  %v48_v14 = vpop.permute.xlu1 %47 }
  0x75   :  { %v28_v44 = vmul.f32 %v26_v27, %v19_v9  ;;  %v29_v45 = vmul.f32 %v27_v28, %v19_v9  ;;  %v93_v46 = vmul.f32 %v91_v29, %v19_v9  ;;  %v94_v47 = vmul.f32 %v92_v30, %v19_v9 }
  0x76   :  { %v56_v48 = vmul.f32 %v54_v31, %v48_v14  ;;  %v57_v49 = vmul.f32 %v55_v32, %v48_v14  ;;  %v113_v50 = vmul.f32 %v111_v33, %v48_v14  ;;  %v114_v51 = vmul.f32 %v112_v34, %v48_v14 }
  0x7d   :  { %v34_v52 = vpop.permute.xlu0 %33  ;;  %v62_v53 = vpop.permute.xlu1 %61 }
  0x7e   :  { %v42_v54 = vmul.f32 %v40_v35, %v34_v52  ;;  %v43_v55 = vmul.f32 %v41_v36, %v34_v52  ;;  %v103_v56 = vmul.f32 %v101_v37, %v34_v52  ;;  %v104_v57 = vmul.f32 %v102_v38, %v34_v52 }
  0x7f   :  { %v70_v58 = vmul.f32 %v68_v40, %v62_v53  ;;  %v71_v59 = vmul.f32 %v69_v41, %v62_v53  ;;  %v123_v60 = vmul.f32 %v121_v42, %v62_v53  ;;  %v124_v61 = vmul.f32 %v122_v43, %v62_v53 }
  0x80   :  { %v44_v62 = vadd.f32 %v42_v54, %v28_v44  ;;  %v45_v63 = vadd.f32 %v43_v55, %v29_v45  ;;  %v105_v0 = vadd.f32 %v103_v56, %v93_v46  ;;  %v106_v1 = vadd.f32 %v104_v57, %v94_v47 }
  0x82   :  { %v58_v2 = vadd.f32 %v56_v48, %v44_v62  ;;  %v59_v3 = vadd.f32 %v57_v49, %v45_v63  ;;  %v115_v4 = vadd.f32 %v113_v50, %v105_v0  ;;  %v116_v5 = vadd.f32 %v114_v51, %v106_v1 }
  0x84   :  { %v72_v6 = vadd.f32 %v70_v58, %v58_v2  ;;  %v73_v7 = vadd.f32 %v71_v59, %v59_v3  ;;  %v125_v8 = vadd.f32 %v123_v60, %v115_v4  ;;  %v126_v9 = vadd.f32 %v124_v61, %v116_v5 }
  0x86   :  { %v80_v11 = vadd.f32 %v78_v39, %v72_v6  ;;  %v81_v12 = vadd.f32 %v78_v39, %v73_v7  ;;  %v134_v13 = vadd.f32 %v132_v10, %v125_v8  ;;  %v135_v14 = vadd.f32 %v132_v10, %v126_v9 }
  0x88   :  { %82 = vst [vmem:[%s211_s3] sm:$0xff] %v80_v11 }
  0x89   :  { %83 = vst [vmem:[%s211_s3 + $0x8] sm:$0xff] %v81_v12 }
  0x8a   :  { %145 = vst [vmem:[%s211_s3 + $0x10] sm:$0xff] %v134_v13 }
  0x8b   :  { %146 = vst [vmem:[%s211_s3 + $0x18] sm:$0xff] %v135_v14 }

</bundles_post_ra>
